<compile_context>
chip_gen: v7x
topology: tpu7x:2x2x1
jax: 0.10.0
libtpu: 0.0.40
codegen_flags: <defaults>
</compile_context>

<pallas_src>
import functools

import jax
import jax.numpy as jnp
from jax.experimental import pallas as pl
from jax.experimental.pallas import tpu as pltpu

_LANE = 128
_TARGET_BLOCK_BYTES = 2 * 1024 * 1024     # aim for >= ~2 MiB live per block
_FALLBACK_VMEM_CAP = 64 * 1024 * 1024     # v7x per-TC VMEM (most conservative)


def _ceil_to(x, m):
    return -(-x // m) * m


def _cdiv(a, b):
    return -(-a // b)


def _vmem_capacity_bytes():
    try:
        return int(pltpu.get_tpu_info().vmem_capacity_bytes)
    except Exception:  # query unavailable -> assume smallest generation (v7x)
        return _FALLBACK_VMEM_CAP


def _choose_blocking(N, C, HW, io_itemsize):
    """Pick (batch_block, spatial_tile, n_hw_tiles, vmem_limit)."""
    # Sublane packing: f32 packs 8 rows / vreg, bf16 16, int8/fp8 32.
    pack_io = 8 * max(1, 4 // io_itemsize)
    c_io = _ceil_to(C, pack_io)
    c_f32 = _ceil_to(C, 8)
    # Bytes per spatial lane per batch row of one live block:
    #   2x double-buffered input + 2x double-buffered output (io dtype)
    #   + ~3 full-precision temporaries (x_f32, x*x, scaled result).
    per_lane = 4 * c_io * io_itemsize + 3 * c_f32 * 4

    vmem_cap = _vmem_capacity_bytes()
    budget = vmem_cap // 4                      # generous headroom on all gens

    max_lanes = max(_LANE, (budget // per_lane) // _LANE * _LANE)

    if HW <= max_lanes:
        # Whole spatial extent fits in one block (full-dim last axis is legal
        # even when HW is not a multiple of 128).
        tile = HW
        n_hw = 1
        bn = 1
        if N > 1:
            # Block several batch images together so small-C shapes are not
            # per-grid-step-overhead bound; keep >= 2 grid steps for megacore.
            per_img = max(1, HW * per_lane)
            bn = min(N, max(1, _TARGET_BLOCK_BYTES // per_img),
                     max(1, budget // per_img))
            bn = min(bn, max(1, _cdiv(N, 2)))
        elif HW >= 2 * _LANE:
            # N == 1: split spatially so both v7x TensorCores get work.
            tile = _ceil_to(_cdiv(HW, 2), _LANE)
            n_hw = _cdiv(HW, tile)
    else:
        tile = max_lanes                        # multiple of 128
        n_hw = _cdiv(HW, tile)                  # ragged edge block -> masked
        bn = 1

    vmem_limit = min(int(vmem_cap * 3 // 4), 100 * 1024 * 1024)
    vmem_limit = max(vmem_limit, 32 * 1024 * 1024)
    return bn, tile, n_hw, vmem_limit


def _l2norm_kernel(x_ref, w_ref, o_ref, *, eps):
    # x_ref: (Bn, C, T) block, w_ref: (C, 1), o_ref: (Bn, C, T)
    x = x_ref[...].astype(jnp.float32)

    # Sum of squares over the channel (sublane) axis -> XLU reduction.
    ss = jnp.sum(x * x, axis=1, keepdims=True)               # (Bn, 1, T)

    norm = jnp.sqrt(ss) + eps                                 # eps on the norm
    # EUP approximate reciprocal + one Newton step -> ~f32 precision.
    r = pl.reciprocal(norm, approx=True)
    r = r * (2.0 - norm * r)

    w = w_ref[...].astype(jnp.float32)[None]                  # (1, C, 1)
    o_ref[...] = (w * (x * r)).astype(o_ref.dtype)


def l2norm(x_nchw, weight, eps=1e-10):
    """SSD L2Norm forward.  x_nchw: (N, C, H, W); weight: (C,)."""
    N, C, H, W = x_nchw.shape
    HW = H * W
    bn, tile, n_hw, vmem_limit = _choose_blocking(
        N, C, HW, jnp.dtype(x_nchw.dtype).itemsize)
    n_b = _cdiv(N, bn)

    x = x_nchw.reshape(N, C, HW)                 # contiguous last-dims reshape
    w = weight.reshape(C, 1).astype(jnp.float32)

    kernel = functools.partial(_l2norm_kernel, eps=eps)

    out = pl.pallas_call(
        kernel,
        out_shape=jax.ShapeDtypeStruct((N, C, HW), x.dtype),
        grid_spec=pltpu.PrefetchScalarGridSpec(
            num_scalar_prefetch=0,
            grid=(n_b, n_hw),
            in_specs=[
                pl.BlockSpec((bn, C, tile), lambda b, t: (b, 0, t)),
                pl.BlockSpec((C, 1), lambda b, t: (0, 0)),
            ],
            out_specs=pl.BlockSpec((bn, C, tile), lambda b, t: (b, 0, t)),
        ),
        compiler_params=pltpu.CompilerParams(
            dimension_semantics=("parallel", "parallel"),
            vmem_limit_bytes=vmem_limit,
        ),
    )(x, w)

    return out.reshape(N, C, H, W)


if __name__ == "__main__":
    # Module setup: L2Norm(n_channels=4, scale=20.0) -> weight = full(4, 20.0)
    n_channels = 4
    scale = 20.0
    eps = 1e-10
    weight = jnp.full((n_channels,), scale, dtype=jnp.float32)

    key = jax.random.PRNGKey(0)
    x = jax.random.normal(key, (2, n_channels, 16, 16), dtype=jnp.float32)

    out = l2norm(x, weight, eps=eps)
    out = jax.block_until_ready(out)

    # Plain-JAX reference for the forward semantics.
    norm = jnp.sqrt(jnp.sum(x * x, axis=1, keepdims=True)) + eps
    ref = weight[None, :, None, None] * (x / norm)

    assert out.shape == x.shape and out.dtype == x.dtype
    assert jnp.allclose(out, ref, atol=1e-5, rtol=1e-4), float(
        jnp.max(jnp.abs(out - ref)))

    print("KERNEL_OK")
</pallas_src>

<mosaic_0001>
module attributes {stable_mosaic.version = 11 : i64} {
  func.func @_l2norm_kernel(%arg0: i32, %arg1: i32, %arg2: memref<1x4x256xf32, #tpu.memory_space<vmem>>, %arg3: memref<4x1xf32, #tpu.memory_space<vmem>>, %arg4: memref<1x4x256xf32, #tpu.memory_space<vmem>>) attributes {dimension_semantics = [#tpu.dimension_semantics<parallel>, #tpu.dimension_semantics<parallel>], iteration_bounds = array<i64: 2, 1>, scalar_prefetch = 0 : i64, scratch_operands = 0 : i64, tpu.core_type = #tpu.core_type<tc>, window_params = [{transform_indices = @transform_0, window_bounds = array<i64: 1, 4, 256>}, {pipeline_mode = #tpu.pipeline_mode<synchronous>, transform_indices = @transform_1, window_bounds = array<i64: 4, 1>}, {transform_indices = @transform_2, window_bounds = array<i64: 1, 4, 256>}]} {
    %c0 = arith.constant 0 : index
    %c0_0 = arith.constant 0 : index
    %c0_1 = arith.constant 0 : index
    %0 = vector.load %arg2[%c0, %c0_0, %c0_1] : memref<1x4x256xf32, #tpu.memory_space<vmem>>, vector<1x4x256xf32>
    %1 = arith.mulf %0, %0 : vector<1x4x256xf32>
    %cst = arith.constant dense<0.000000e+00> : vector<1x256xf32>
    %2 = vector.multi_reduction <add>, %1, %cst [1] : vector<1x4x256xf32> to vector<1x256xf32>
    %3 = vector.shape_cast %2 : vector<1x256xf32> to vector<1x1x256xf32>
    %4 = math.sqrt %3 : vector<1x1x256xf32>
    %cst_2 = arith.constant 1.000000e-10 : f32
    %5 = vector.broadcast %cst_2 : f32 to vector<1x1x256xf32>
    %6 = arith.addf %4, %5 : vector<1x1x256xf32>
    %7 = tpu.reciprocal %6 {approx = true} : vector<1x1x256xf32> -> vector<1x1x256xf32>
    %8 = arith.mulf %6, %7 : vector<1x1x256xf32>
    %cst_3 = arith.constant 2.000000e+00 : f32
    %9 = vector.broadcast %cst_3 : f32 to vector<1x1x256xf32>
    %10 = arith.subf %9, %8 : vector<1x1x256xf32>
    %11 = arith.mulf %7, %10 : vector<1x1x256xf32>
    %c0_4 = arith.constant 0 : index
    %c0_5 = arith.constant 0 : index
    %12 = vector.load %arg3[%c0_4, %c0_5] : memref<4x1xf32, #tpu.memory_space<vmem>>, vector<4x1xf32>
    %13 = vector.shape_cast %12 : vector<4x1xf32> to vector<1x4x1xf32>
    %14 = vector.broadcast %11 : vector<1x1x256xf32> to vector<1x4x256xf32>
    %15 = arith.mulf %0, %14 : vector<1x4x256xf32>
    %16 = vector.broadcast %13 : vector<1x4x1xf32> to vector<1x4x256xf32>
    %17 = arith.mulf %16, %15 : vector<1x4x256xf32>
    %c0_6 = arith.constant 0 : index
    %c0_7 = arith.constant 0 : index
    %c0_8 = arith.constant 0 : index
    %18 = vector.load %arg4[%c0_6, %c0_7, %c0_8] : memref<1x4x256xf32, #tpu.memory_space<vmem>>, vector<1x4x256xf32>
    tpu.vector_store %arg4[%c0_6, %c0_7, %c0_8], %17 {strides = array<i32>} : memref<1x4x256xf32, #tpu.memory_space<vmem>>, vector<1x4x256xf32>,
    return
  }
  func.func @transform_0(%arg0: i32, %arg1: i32) -> (i32, i32, i32) {
    %c0_i32 = arith.constant 0 : i32
    %c0_i32_0 = arith.constant 0 : i32
    return %arg0, %c0_i32, %arg1 : i32, i32, i32
  }
  func.func @transform_1(%arg0: i32, %arg1: i32) -> (i32, i32) {
    %c0_i32 = arith.constant 0 : i32
    %c0_i32_0 = arith.constant 0 : i32
    %c0_i32_1 = arith.constant 0 : i32
    return %c0_i32, %c0_i32_0 : i32, i32
  }
  func.func @transform_2(%arg0: i32, %arg1: i32) -> (i32, i32, i32) {
    %c0_i32 = arith.constant 0 : i32
    %c0_i32_0 = arith.constant 0 : i32
    return %arg0, %c0_i32, %arg1 : i32, i32, i32
  }
}

</mosaic_0001>

<bundles_post_ra>
// kernel: tpu_custom_call.1
= control target key start
LH: loop header
LB: loop body
LE: loop exit
PB: predicated region body
PF: predicated region fallthrough
CT: control target
= control target key end

     0   :  { %7 = vsyncpa [#allocation3], 0  ;;  %s746_s0 = inlined_call_operand.hbm [shape: f32[2,4,256], index: 0, kind: input, shape index: {}]   ;;  %s747_s1 = inlined_call_operand.vmem [shape: f32[4,1], index: 1, kind: input, shape index: {}]   ;;  %s748_s2 = inlined_call_operand.hbm [shape: f32[2,4,256], index: 2, kind: output, shape index: {}]  }
   0x1   :  { %9 = vsyncpa [#allocation3 + $0x1], 0 }
   0x2   :  { %10 = vsyncpa [#allocation4], 0 }
   0x3   :  { %12 = vsyncpa [#allocation4 + $0x1], 0  ;;  %s567_s9 = smov 0   ;;  %s569_s10 = smov 0  }
   0x4   :  { %s571_s11 = smov 0   ;;  %s573_s12 = smov 0  }
   0x5   :  { %s575_s13 = smov 0   ;;  %s577_s14 = smov 0  }
   0x6 LB: > { %s346_s15 = sadd.s32 4294967295, %s547_s14   ;;  %s347_s16 = sadd.s32 4294967294, %s547_s14   ;;  %s547_s14 = sphi %s577_s14, %s18_s14   ;;  %s543_s13 = sphi %s575_s13, %s764_s13   ;;  %s539_s12 = sphi %s573_s12, %s763_s12   ;;  %s535_s11 = sphi %s571_s11, %s762_s11   ;;  %s531_s10 = sphi %s569_s10, %s761_s10   ;;  %s527_s9 = sphi %s567_s9, %s760_s9  }
   0x7   : > { %s30_s17 = sadd.s32 1, %s543_s13  ;;  %s39_s18 = sadd.s32 1, %s535_s11 }
   0x8   : > { %p32_p0 = scmp.ge.s32.totalorder %s30_s17, 2  ;;  %p46_p1 = scmp.ne.s32.totalorder %s535_s11, %s531_s10 }
   0x9   : > { %p47_p2 = scmp.eq.s32.totalorder %s547_s14, 0  ;;  %p52_p3 = scmp.ne.s32.totalorder %s531_s10, %s527_s9 }
   0xa   : > { %s766_s17 = smov (%p32_p0, %s30_s17), 0  ;;  %p53_p5 = scmp.eq.s32.totalorder %s346_s15, 0 }
   0xb   : > { %p608_p4 = por %p47_p2, %p46_p1  ;;  %s34_s20 = ssub.s32 %s543_s13, %s766_s17 }
   0xc   : > { %p99_p6 = scmp.eq.s32.totalorder %s346_s15, 1  ;;  %p37_p7 = scmp.eq.s32.totalorder %s34_s20, 0 }
   0xd   : > { %p614_p8 = por %p53_p5, %p52_p3  ;;  %p105_p10 = scmp.eq.s32.totalorder %s347_s16, 1 }
   0xe   : > { %p618_p9 = por %p99_p6, %p46_p1  ;;  %p375_p13 = scmp.lt.s32.totalorder %s547_s14, 2 }
   0xf   : > { %s623_s23 = scalar_select %p37_p7, %s535_s11, %s39_s18  }
  0x10   : > { %s752_s22 = scalar_select %p618_p9, 1, 0 }
  0x11   : > { %p625_p11 = por %p105_p10, %p52_p3  ;;  %s128_s25 = sand.u32 1, %s535_s11  }
  0x12   : > { %s350_s26 = sshll.u32 %s128_s25, 3  ;;  %s361_s27 = sshll.u32 %s543_s13, 7 }
  0x13   : > { %s753_s24 = scalar_select %p625_p11, 1, 0 }
  0x14   : > { %s636_s30 = scalar_lea.hbm %s746_s0, %s361_s27  ;;  %s132_s3 = scalar_lea.vmem [#allocation2], %s350_s26 }
  0x15   : > { %s142_s4 = sshll.u32 %s132_s3, 4  ;;  %p642_p0 = pnand %p375_p13, %p608_p4  ;;  %s638_s4 = int_to_ptr.vmem [resolvable:$true] %s142_s4 }
  0x16   : > { %s129_s6 = scalar_lea.sflag [#allocation3], %s128_s25  ;;  %s435_s7 = scalar_lea.hbm %s636_s30, 128 }
  0x17   : > { %p436_p3 = scmp.ne.s32.totalorder %s636_s30, %s435_s7  ;;  %p437_p5 = pneg %p642_p0 }
  0x18   : > { %s440_s16 = scalar_lea.hbm %s746_s0, 256  ;;  %p441_p4 = scmp.lt.u32.totalorder %s636_s30, %s746_s0 }
  0x19   : > { %p438_p6 = pnand %p437_p5, %p436_p3  ;;  %p442_p10 = scmp.lt.u32.totalorder %s440_s16, %s435_s7 }
  0x1a   : > { %p444_p12 = scmp.lt.u32.totalorder %s435_s7, %s636_s30 }
  0x1b   : > { %p439_p7 = pneg %p438_p6  ;;  %p443_p13 = por %p442_p10, %p441_p4 }
  0x1d   : > { %p445_p1 = por %p444_p12, %p443_p13 }
  0x1f   : > { %p446_p2 = pnand %p445_p1, %p439_p7 }
  0x21   : > { %449 = shalt.err (!%p446_p2)
}
  0x22   : > { %s450_s20 = scalar_lea.vmem %s638_s4, 128  ;;  %s549_s25 = smov [#allocation2]  }
  0x23   : > { %p451_p3 = scmp.ne.s32.totalorder %s638_s4, %s450_s20  ;;  %s455_s26 = sshll.u32 %s549_s25, 4  ;;  %s456_s26 = int_to_ptr.vmem [resolvable:$false] %s455_s26 }
  0x24   : > { %s457_s27 = scalar_lea.vmem %s456_s26, 256  ;;  %p458_p9 = scmp.lt.s32.totalorder %s638_s4, %s456_s26 }
  0x25   : > { %p453_p6 = pnand %p451_p3, %p437_p5  ;;  %p459_p4 = scmp.lt.s32.totalorder %s457_s27, %s450_s20 }
  0x27   : > { %p454_p11 = pneg %p453_p6  ;;  %p460_p10 = por %p459_p4, %p458_p9 }
  0x29   : > { %p461_p12 = pnand %p460_p10, %p454_p11 }
  0x2b   : > { %464 = shalt.err (!%p461_p12)
}
  0x2c   : > { %370 = dma.hbm_to_vmem [thread:$0]  (!%p642_p0), %s636_s30, 128, %s638_s4, %s129_s6  }
  0x2d   : > { %p755_p1 = scmp.lt.s32.totalorder %s547_s14, 3  ;;  %p756_p2 = scmp.ge.s32.totalorder %s547_s14, 1 }
  0x2f   : > { %p148_p5 = pnand %p756_p2, %p755_p1 }
  0x30   : > { %s678_s28 = sand.u32 (!%p148_p5), 1, %s531_s10  }
  0x31   : > { %151 = sbr.rel (%p148_p5) target bundleno = 205 (0xcd), region = 28  ;;  %s354_s29 = sshll.u32 (!%p148_p5), %s678_s28, 3 }
  0x32   : > { %s154_s3 = scalar_lea.sflag (!%p148_p5), [#allocation3], %s678_s28  ;;  %s157_s5 = scalar_lea.vmem (!%p148_p5), [#allocation2], %s354_s29 }
  0x38   : > { %518 = dma.done.wait (%p614_p8), %s154_s3, 128  }
  0x39   : > { %520 = vsyncadd (%p614_p8), %s154_s3, 4294967168  ;;  %v550_v0 = vmov 0   ;;  %v224_v1 = vld [vmem:[%s747_s1] sm:$0xf]  ;;  %vm185_vm0 = vcmask 1043456   ;;  %s362_s21 = sshll.u32 %s539_s12, 7 }
  0x3a   : > { %426 = vset.pattern.permute.xlu0 %v550_v0  ;;  %v180_v2 = vld [vmem:[%s157_s5] sm:$0xff]  ;;  %s177_s6 = scalar_lea.vmem [#allocation5], %s354_s29  ;;  %s697_s16 = scalar_lea.hbm %s748_s2, %s362_s21 }
  0x3b   : > { %232 = vperm.xlu0 %426, %v224_v1   ;;  %v181_v3 = vmul.f32 %v180_v2, %v180_v2  ;;  %s262_s7 = sshll.u32 %s177_s6, 4  ;;  %s246_s18 = scalar_lea.sflag [#allocation4], %s678_s28  ;;  %s699_s7 = int_to_ptr.vmem [resolvable:$true] %s262_s7 }
  0x3c   : > { %s465_s19 = scalar_lea.vmem %s699_s7, 128  ;;  %p757_p9 = scmp.ne.s32.totalorder %s752_s22, 0 }
  0x3d   : > { %v183_v4 = vcombine.high %v181_v3, %v181_v3  ;;  %v186_v5 = vsel %vm185_vm0, %v181_v3, 0.0  ;;  %p466_p8 = scmp.ne.s32.totalorder %s699_s7, %s465_s19  ;;  %s551_s12 = smov [#allocation5]  }
  0x3e   : > { %v187_v7 = vrot.slane %v186_v5, 4  ;;  %s469_s20 = sshll.u32 %s551_s12, 4  ;;  %s470_s20 = int_to_ptr.vmem [resolvable:$false] %s469_s20 }
  0x3f   : > { %v193_v6 = vsel %vm185_vm0, %v183_v4, 0.0  ;;  %p467_p11 = pnand %p466_p8, %p757_p9  ;;  %s471_s25 = scalar_lea.vmem %s470_s20, 256 }
  0x40   : > { %v194_v8 = vrot.slane %v193_v6, 4  ;;  %v188_v9 = vadd.f32 %v187_v7, %v186_v5  ;;  %p472_p7 = scmp.lt.s32.totalorder %s699_s7, %s470_s20  ;;  %p473_p13 = scmp.lt.s32.totalorder %s471_s25, %s465_s19 }
  0x41   : > { %p468_p0 = pneg %p467_p11 }
  0x42   : > { %v195_v10 = vadd.f32 %v194_v8, %v193_v6  ;;  %v189_v11 = vrot.slane %v188_v9, 2  ;;  %p474_p3 = por %p473_p13, %p472_p7 }
  0x44   : > { %v196_v12 = vrot.slane %v195_v10, 2  ;;  %v190_v13 = vadd.f32 %v189_v11, %v188_v9  ;;  %p475_p6 = pnand %p474_p3, %p468_p0 }
  0x46   : > { %v197_v14 = vadd.f32 %v196_v12, %v195_v10  ;;  %v191_v15 = vrot.slane %v190_v13, 1 }
  0x48   : > { %v198_v16 = vrot.slane %v197_v14, 1  ;;  %v192_v17 = vadd.f32 %v191_v15, %v190_v13 }
  0x4a   : > { %v199_v18 = vadd.f32 %v198_v16, %v197_v14  ;;  %427 = vrsqrt.f32 %v192_v17  ;;  %vm202_vm1 = vcmp.eq.f32.partialorder %v192_v17, inf  ;;  %v205_v23 = vand.u32 2147483648, %v192_v17 }
  0x4b   : > { %vm204_vm3 = vcmp.eq.f32.partialorder %v192_v17, 0.0 }
  0x4c   : > { %429 = vrsqrt.f32 %v199_v18  ;;  %vm209_vm2 = vcmp.eq.f32.partialorder %v199_v18, inf  ;;  %v212_v25 = vand.u32 2147483648, %v199_v18  ;;  %vm211_vm4 = vcmp.eq.f32.partialorder %v199_v18, 0.0 }
  0x54   : > { %v428_v19 = vpop.eup %427 }
  0x55   : > { %v201_v21 = vmul.f32 %v428_v19, %v192_v17 }
  0x56   : > { %v430_v20 = vpop.eup %429 }
  0x57   : > { %v208_v22 = vmul.f32 %v430_v20, %v199_v18  ;;  %v203_v24 = vsel %vm202_vm1, %v192_v17, %v201_v21 }
  0x58   : > { %v206_v27 = vsel %vm204_vm3, %v205_v23, %v203_v24 }
  0x59   : > { %v210_v26 = vsel %vm209_vm2, %v199_v18, %v208_v22  ;;  %v214_v29 = vadd.f32 1e-10, %v206_v27 }
  0x5a   : > { %v213_v28 = vsel %vm211_vm4, %v212_v25, %v210_v26 }
  0x5b   : > { %v215_v30 = vadd.f32 1e-10, %v213_v28  ;;  %431 = vrcp.f32 %v214_v29 }
  0x5d   : > { %433 = vrcp.f32 %v215_v30 }
  0x65   : > { %v432_v31 = vpop.eup %431 }
  0x66   : > { %v218_v33 = vmul.f32 %v432_v31, %v214_v29 }
  0x67   : > { %v434_v32 = vpop.eup %433 }
  0x68   : > { %v219_v34 = vmul.f32 %v434_v32, %v215_v30  ;;  %v220_v35 = vsub.f32 2.0, %v218_v33 }
  0x6a   : > { %v221_v36 = vsub.f32 2.0, %v219_v34  ;;  %v222_v37 = vmul.f32 %v432_v31, %v220_v35 }
  0x6c   : > { %v223_v38 = vmul.f32 %v434_v32, %v221_v36 }
  0x6e   : > { %v227_v39 = vcombine.low %v222_v37, %v223_v38 }
  0x70   : > { %v229_v40 = vmul.f32 %v227_v39, %v180_v2 }
  0x72   : > { %v236_v41 = vcombine.high %v229_v40, %v229_v40 }
  0xba   : > { %v233_v42 = vpop.permute.xlu0 %232 }
  0xbb   : > { %v238_v43 = vmul.f32 %v233_v42, %v229_v40  ;;  %v239_v44 = vmul.f32 %v236_v41, %v233_v42 }
  0xbd   : > { %v242_v45 = vcombine.low %v238_v43, %v239_v44 }
  0xbf   : > { %244 = vst [vmem:[%s177_s6] sm:$0xff] %v242_v45 }
  0xc0   : > { %478 = shalt.err (!%p475_p6)
}
  0xc1   : > { %s479_s26 = scalar_lea.hbm %s697_s16, 128  ;;  %s483_s29 = scalar_lea.hbm %s748_s2, 256 }
  0xc2   : > { %p480_p4 = scmp.ne.s32.totalorder %s697_s16, %s479_s26  ;;  %p484_p1 = scmp.lt.u32.totalorder %s697_s16, %s748_s2 }
  0xc3   : > { %p485_p2 = scmp.lt.u32.totalorder %s483_s29, %s479_s26  ;;  %p487_p8 = scmp.lt.u32.totalorder %s479_s26, %s697_s16 }
  0xc4   : > { %p481_p10 = pnand %p480_p4, %p757_p9 }
  0xc5   : > { %p486_p5 = por %p485_p2, %p484_p1 }
  0xc6   : > { %p482_p12 = pneg %p481_p10 }
  0xc7   : > { %p488_p11 = por %p487_p8, %p486_p5 }
  0xc9   : > { %p489_p0 = pnand %p488_p11, %p482_p12 }
  0xcb   : > { %492 = shalt.err (!%p489_p0)
}
  0xcc   : > { %365 = dma.vmem_to_hbm [thread:$0]  (%p757_p9), %s699_s7, 128, %s697_s16, %s246_s18  }
  0xcd PF: > { %s274_s30 = sand.u32 1, %s527_s9   ;;  %p758_p7 = scmp.ne.s32.totalorder %s753_s24, 0 }
  0xce   : > { %p759_p13 = scmp.ge.s32.totalorder %s547_s14, 2  ;;  %s275_s4 = scalar_lea.sflag [#allocation4], %s274_s30 }
  0xd0   : > { %p372_p3 = pnand %p759_p13, %p758_p7 }
  0xd2   : > { %522 = dma.done.wait (!%p372_p3), %s275_s4, 128  }
  0xd3   : > { %524 = vsyncadd (!%p372_p3), %s275_s4, 4294967168  ;;  %s18_s14 = sadd.s32 1, %s547_s14   ;;  %s760_s9 = smov %s531_s10 }
  0xd4   : > { %p15_p6 = scmp.ge.s32.totalorder %s18_s14, 4   ;;  %s761_s10 = smov %s535_s11 }
  0xd5   : > { %s762_s11 = smov %s623_s23  ;;  %s763_s12 = smov %s543_s13 }
  0xd6   : > { %s764_s13 = smov %s766_s17  ;;  %17 = sbr.rel (!%p15_p6) target bundleno = 6 (0x6), region = 73 }
  0xdd   :  { %280 = vsyncpa [#allocation3], 1 }
  0xde   :  { %282 = vsyncpa [#allocation3 + $0x1], 1 }
  0xdf   :  { %283 = vsyncpa [#allocation4], 1 }
  0xe0   :  { %285 = vsyncpa [#allocation4 + $0x1], 1 }

</bundles_post_ra>
